<compile_context>
chip_gen: v5e
topology: v5e:2x2
jax: 0.10.0
libtpu: 0.0.40
codegen_flags: <defaults>
</compile_context>

<pallas_src>
import functools

import jax
import jax.numpy as jnp
from jax import lax
from jax.experimental import pallas as pl
from jax.experimental.pallas import tpu as pltpu

_EPS = 1e-9
_LANE = 128


def _num_parallel_cores():
    """2 for multi-TensorCore chips (v7x-class / megacore), 1 for v5e/v6e."""
    try:
        kind = jax.devices()[0].device_kind.lower()
    except Exception:
        return 2
    single_tc_markers = ("v5 lite", "v5e", "v5litepod", "v6 lite", "v6e", "v6lite")
    if any(m in kind for m in single_tc_markers):
        return 1
    return 2


def _qce_kernel(q_ref, t_ref, out_ref, acc_ref, *,
                n_valid_rows, block_rows, chunk_rows):
    c = pl.program_id(0)            # megacore split axis ("parallel")
    i = pl.program_id(1)            # reduction axis ("arbitrary")
    n_inner = pl.num_programs(1)

    b = c * n_inner + i             # un-clamped linear block index
    base_row = b * block_rows       # global row offset of this block
    n_chunks = block_rows // chunk_rows   # static

    @pl.when(i == 0)
    def _init():
        acc_ref[...] = jnp.zeros_like(acc_ref)

    def _contrib(r0):
        qv = q_ref[pl.ds(r0, chunk_rows), :].astype(jnp.float32)
        tv = t_ref[pl.ds(r0, chunk_rows), :].astype(jnp.float32)
        return tv * jnp.log(qv + jnp.float32(_EPS))

    zero = jnp.zeros((chunk_rows, _LANE), jnp.float32)
    block_fully_valid = base_row + block_rows <= n_valid_rows

    # Hot path: every row of the block is in range -> no masking work at all.
    @pl.when(block_fully_valid)
    def _full():
        def body(g, acc):
            r0 = pl.multiple_of(g * chunk_rows, chunk_rows)
            return acc + _contrib(r0)
        acc = lax.fori_loop(0, n_chunks, body, zero)
        acc_ref[...] += acc.reshape(chunk_rows // 8, 8, _LANE).sum(axis=0)

    # Boundary block (ragged last block) or clamped duplicate block: mask the
    # *product* per row so garbage in the out-of-range tail (possible NaN/-inf
    # from log of unspecified data) never propagates.
    @pl.when(jnp.logical_not(block_fully_valid))
    def _masked():
        def body(g, acc):
            r0 = pl.multiple_of(g * chunk_rows, chunk_rows)
            row = lax.broadcasted_iota(jnp.int32, (chunk_rows, _LANE), 0)
            valid = (base_row + r0 + row) < n_valid_rows
            return acc + jnp.where(valid, _contrib(r0), jnp.float32(0.0))
        acc = lax.fori_loop(0, n_chunks, body, zero)
        acc_ref[...] += acc.reshape(chunk_rows // 8, 8, _LANE).sum(axis=0)

    @pl.when(i == n_inner - 1)
    def _finalize():
        out_ref[0, 0] = -jnp.sum(acc_ref[...])


@functools.partial(jax.jit, static_argnames=("block_rows",))
def quantum_cross_entropy_loss(quantum_output, target_output, block_rows=None):
    """Computes -sum(target * log(quantum + 1e-9)) with a Pallas TPU kernel."""
    q = quantum_output.reshape(-1)      # free bitcast; keep native dtype
    t = target_output.reshape(-1)
    n = q.shape[0]

    itemsize = max(jnp.dtype(quantum_output.dtype).itemsize,
                   jnp.dtype(target_output.dtype).itemsize)

    # Main region = largest prefix that is a multiple of 8*128 elements, so the
    # (rows, 128) view is a free reshape and rows is a multiple of 8.
    sub_block = 8 * _LANE
    rows = (n // sub_block) * 8
    n_main = rows * _LANE
    rem = n - n_main                    # <= 1023 elements

    tail = jnp.float32(0.0)
    if rem:
        q_tail = lax.slice(q, (n_main,), (n,)).astype(jnp.float32)
        t_tail = lax.slice(t, (n_main,), (n,)).astype(jnp.float32)
        tail = -jnp.sum(t_tail * jnp.log(q_tail + jnp.float32(_EPS)))

    if rows == 0:
        # Entire input handled by the tiny tail path.
        return tail

    if rem:
        # Ragged case only: at most one prefix copy (no padded writes).
        # TODO(synk): a fully zero-copy ragged path would need a manual-DMA
        # 1-D variant of the kernel.
        q_main = lax.slice(q, (0,), (n_main,))
        t_main = lax.slice(t, (0,), (n_main,))
    else:
        q_main, t_main = q, t
    q2 = q_main.reshape(rows, _LANE)
    t2 = t_main.reshape(rows, _LANE)

    # Block size: target ~4 MiB per input per block (8192 rows f32, 16384 bf16)
    # so each grid step moves >= ~8 MiB total and the ~0.35 us/step overhead is
    # amortized; 2 inputs x 2 pipeline buffers ~= 16 MiB VMEM.
    if block_rows is None:
        block_rows = (4 * 1024 * 1024) // (_LANE * itemsize)
    block_rows = max(8, (int(block_rows) // 8) * 8)   # multiple of 8 (8,128 rule)
    block_rows = min(block_rows, rows)

    # In-kernel streaming chunk: multiple of 8, divides block_rows, small enough
    # that each chunk (q, t, contrib, carry) stays register-resident.
    chunk_rows = next(c for c in (64, 32, 16, 8) if block_rows % c == 0)

    n_blocks = (rows + block_rows - 1) // block_rows
    n_cores = min(_num_parallel_cores(), n_blocks)
    n_inner = (n_blocks + n_cores - 1) // n_cores

    def in_map(c, i):
        # Clamp fully out-of-range blocks (odd n_blocks on 2-core split); their
        # contribution is zeroed by the in-kernel row mask.
        return (jnp.minimum(c * n_inner + i, n_blocks - 1), 0)

    kernel = functools.partial(_qce_kernel, n_valid_rows=rows,
                               block_rows=block_rows, chunk_rows=chunk_rows)

    bytes_in = n * (jnp.dtype(quantum_output.dtype).itemsize
                    + jnp.dtype(target_output.dtype).itemsize)
    cost = pl.CostEstimate(flops=3 * n, transcendentals=n,
                           bytes_accessed=bytes_in + 8)

    partials = pl.pallas_call(
        kernel,
        out_shape=jax.ShapeDtypeStruct((n_cores, 1), jnp.float32),
        grid=(n_cores, n_inner),
        in_specs=[
            pl.BlockSpec((block_rows, _LANE), in_map),
            pl.BlockSpec((block_rows, _LANE), in_map),
        ],
        out_specs=pl.BlockSpec(
            (1, 1), lambda c, i: (c, 0), memory_space=pltpu.MemorySpace.SMEM
        ),
        scratch_shapes=[pltpu.VMEM((8, _LANE), jnp.float32)],
        compiler_params=pltpu.CompilerParams(
            dimension_semantics=("parallel", "arbitrary"),
            vmem_limit_bytes=32 * 1024 * 1024,
        ),
        cost_estimate=cost,
    )(q2, t2)
    return jnp.sum(partials) + tail


if __name__ == "__main__":
    # Deterministic small example: batch=2, channels=4, spatial=16x16
    key = jax.random.PRNGKey(0)
    k_q, k_t, k_q2, k_t2 = jax.random.split(key, 4)

    logits_q = jax.random.normal(k_q, (2, 4, 16, 16), dtype=jnp.float32)
    logits_t = jax.random.normal(k_t, (2, 4, 16, 16), dtype=jnp.float32)

    # probability-like inputs (positive), matching typical use of the loss
    quantum_output = jax.nn.softmax(logits_q, axis=1)
    target_output = jax.nn.softmax(logits_t, axis=1)

    loss = quantum_cross_entropy_loss(quantum_output, target_output)
    loss = jax.block_until_ready(loss)

    ref = -jnp.sum(target_output * jnp.log(quantum_output + _EPS))
    assert jnp.allclose(loss, ref, rtol=1e-5, atol=1e-4), (loss, ref)

    # Secondary check: ragged size (not a multiple of 1024) + multi-block grid
    # with a partially-valid last block, exercising the masked branch, the
    # jnp tail path and the core-split / clamped-block handling.
    q_raw = jax.nn.softmax(
        jax.random.normal(k_q2, (3, 7, 33, 19), dtype=jnp.float32), axis=1)
    t_raw = jax.nn.softmax(
        jax.random.normal(k_t2, (3, 7, 33, 19), dtype=jnp.float32), axis=1)
    loss2 = quantum_cross_entropy_loss(q_raw, t_raw, block_rows=40)
    loss2 = jax.block_until_ready(loss2)
    ref2 = -jnp.sum(t_raw * jnp.log(q_raw + _EPS))
    assert jnp.allclose(loss2, ref2, rtol=1e-5, atol=1e-4), (loss2, ref2)

    print("KERNEL_OK")
</pallas_src>

<mosaic_0001>
module attributes {stable_mosaic.version = 11 : i64} {
  func.func @_qce_kernel(%arg0: i32, %arg1: i32, %arg2: memref<16x128xf32, #tpu.memory_space<vmem>>, %arg3: memref<16x128xf32, #tpu.memory_space<vmem>>, %arg4: memref<1x1xf32, #tpu.memory_space<smem>>, %arg5: memref<8x128xf32, #tpu.memory_space<vmem>>) attributes {dimension_semantics = [#tpu.dimension_semantics<parallel>, #tpu.dimension_semantics<arbitrary>], iteration_bounds = array<i64: 1, 1>, scalar_prefetch = 0 : i64, scratch_operands = 1 : i64, tpu.core_type = #tpu.core_type<tc>, window_params = [{transform_indices = @transform_0, window_bounds = array<i64: 16, 128>}, {transform_indices = @transform_1, window_bounds = array<i64: 16, 128>}, {transform_indices = @transform_2, window_bounds = array<i64: 1, 1>}]} {
    %c1_i32 = arith.constant 1 : i32
    %0 = arith.muli %arg0, %c1_i32 : i32
    %1 = arith.addi %0, %arg1 : i32
    %c16_i32 = arith.constant 16 : i32
    %2 = arith.muli %1, %c16_i32 : i32
    %c0_i32 = arith.constant 0 : i32
    %3 = arith.cmpi eq, %arg1, %c0_i32 : i32
    %4 = arith.extui %3 : i1 to i32
    %c0_i32_0 = arith.constant 0 : i32
    %5 = arith.cmpi ne, %4, %c0_i32_0 : i32
    scf.if %5 {
      %cst_7 = arith.constant 0.000000e+00 : f32
      %17 = vector.broadcast %cst_7 : f32 to vector<8x128xf32>
      %c0 = arith.constant 0 : index
      %c0_8 = arith.constant 0 : index
      %18 = vector.load %arg5[%c0, %c0_8] : memref<8x128xf32, #tpu.memory_space<vmem>>, vector<8x128xf32>
      tpu.vector_store %arg5[%c0, %c0_8], %17 {strides = array<i32>} : memref<8x128xf32, #tpu.memory_space<vmem>>, vector<8x128xf32>,
    } else {
    }
    %cst = arith.constant 0.000000e+00 : f32
    %6 = vector.broadcast %cst : f32 to vector<16x128xf32>
    %c16_i32_1 = arith.constant 16 : i32
    %7 = arith.addi %2, %c16_i32_1 : i32
    %c16_i32_2 = arith.constant 16 : i32
    %8 = arith.cmpi sle, %7, %c16_i32_2 : i32
    %9 = arith.extui %8 : i1 to i32
    %c0_i32_3 = arith.constant 0 : i32
    %10 = arith.cmpi ne, %9, %c0_i32_3 : i32
    scf.if %10 {
      %c0_i32_7 = arith.constant 0 : i32
      %c16_i32_8 = arith.constant 16 : i32
      %17 = arith.muli %c0_i32_7, %c16_i32_8 : i32
      %18 = tpu.assume_multiple %17, 16 : i32
      %19 = arith.index_cast %18 : i32 to index
      %c0 = arith.constant 0 : index
      %20 = vector.load %arg2[%19, %c0] : memref<16x128xf32, #tpu.memory_space<vmem>>, vector<16x128xf32>
      %21 = arith.index_cast %18 : i32 to index
      %c0_9 = arith.constant 0 : index
      %22 = vector.load %arg3[%21, %c0_9] : memref<16x128xf32, #tpu.memory_space<vmem>>, vector<16x128xf32>
      %cst_10 = arith.constant 9.99999971E-10 : f32
      %23 = vector.broadcast %cst_10 : f32 to vector<16x128xf32>
      %24 = arith.addf %20, %23 : vector<16x128xf32>
      %25 = math.log %24 : vector<16x128xf32>
      %26 = arith.mulf %22, %25 : vector<16x128xf32>
      %27 = arith.addf %6, %26 : vector<16x128xf32>
      %c1_i32_11 = arith.constant 1 : i32
      %c0_12 = arith.constant 0 : index
      %c0_13 = arith.constant 0 : index
      %28 = vector.load %arg5[%c0_12, %c0_13] : memref<8x128xf32, #tpu.memory_space<vmem>>, vector<8x128xf32>
      %29 = vector.shape_cast %27 : vector<16x128xf32> to vector<2x8x128xf32>
      %cst_14 = arith.constant dense<0.000000e+00> : vector<8x128xf32>
      %30 = vector.multi_reduction <add>, %29, %cst_14 [0] : vector<2x8x128xf32> to vector<8x128xf32>
      %31 = arith.addf %28, %30 : vector<8x128xf32>
      %c0_15 = arith.constant 0 : index
      %c0_16 = arith.constant 0 : index
      %32 = vector.load %arg5[%c0_15, %c0_16] : memref<8x128xf32, #tpu.memory_space<vmem>>, vector<8x128xf32>
      tpu.vector_store %arg5[%c0_15, %c0_16], %31 {strides = array<i32>} : memref<8x128xf32, #tpu.memory_space<vmem>>, vector<8x128xf32>,
    } else {
    }
    %true = arith.constant true
    %11 = arith.xori %8, %true : i1
    %12 = arith.extui %11 : i1 to i32
    %c0_i32_4 = arith.constant 0 : i32
    %13 = arith.cmpi ne, %12, %c0_i32_4 : i32
    scf.if %13 {
      %c0_i32_7 = arith.constant 0 : i32
      %c16_i32_8 = arith.constant 16 : i32
      %17 = arith.muli %c0_i32_7, %c16_i32_8 : i32
      %18 = tpu.assume_multiple %17, 16 : i32
      %19 = tpu.iota {dimensions = array<i32: 0>} : vector<16x128xi32>
      %20 = arith.addi %2, %18 : i32
      %21 = vector.broadcast %20 : i32 to vector<16x128xi32>
      %22 = arith.addi %21, %19 : vector<16x128xi32>
      %c16_i32_9 = arith.constant 16 : i32
      %23 = vector.broadcast %c16_i32_9 : i32 to vector<16x128xi32>
      %24 = arith.cmpi slt, %22, %23 : vector<16x128xi32>
      %25 = arith.index_cast %18 : i32 to index
      %c0 = arith.constant 0 : index
      %26 = vector.load %arg2[%25, %c0] : memref<16x128xf32, #tpu.memory_space<vmem>>, vector<16x128xf32>
      %27 = arith.index_cast %18 : i32 to index
      %c0_10 = arith.constant 0 : index
      %28 = vector.load %arg3[%27, %c0_10] : memref<16x128xf32, #tpu.memory_space<vmem>>, vector<16x128xf32>
      %cst_11 = arith.constant 9.99999971E-10 : f32
      %29 = vector.broadcast %cst_11 : f32 to vector<16x128xf32>
      %30 = arith.addf %26, %29 : vector<16x128xf32>
      %31 = math.log %30 : vector<16x128xf32>
      %32 = arith.mulf %28, %31 : vector<16x128xf32>
      %cst_12 = arith.constant 0.000000e+00 : f32
      %33 = vector.broadcast %cst_12 : f32 to vector<16x128xf32>
      %34 = arith.select %24, %32, %33 : vector<16x128xi1>, vector<16x128xf32>
      %35 = arith.addf %6, %34 : vector<16x128xf32>
      %c1_i32_13 = arith.constant 1 : i32
      %c0_14 = arith.constant 0 : index
      %c0_15 = arith.constant 0 : index
      %36 = vector.load %arg5[%c0_14, %c0_15] : memref<8x128xf32, #tpu.memory_space<vmem>>, vector<8x128xf32>
      %37 = vector.shape_cast %35 : vector<16x128xf32> to vector<2x8x128xf32>
      %cst_16 = arith.constant dense<0.000000e+00> : vector<8x128xf32>
      %38 = vector.multi_reduction <add>, %37, %cst_16 [0] : vector<2x8x128xf32> to vector<8x128xf32>
      %39 = arith.addf %36, %38 : vector<8x128xf32>
      %c0_17 = arith.constant 0 : index
      %c0_18 = arith.constant 0 : index
      %40 = vector.load %arg5[%c0_17, %c0_18] : memref<8x128xf32, #tpu.memory_space<vmem>>, vector<8x128xf32>
      tpu.vector_store %arg5[%c0_17, %c0_18], %39 {strides = array<i32>} : memref<8x128xf32, #tpu.memory_space<vmem>>, vector<8x128xf32>,
    } else {
    }
    %c0_i32_5 = arith.constant 0 : i32
    %14 = arith.cmpi eq, %arg1, %c0_i32_5 : i32
    %15 = arith.extui %14 : i1 to i32
    %c0_i32_6 = arith.constant 0 : i32
    %16 = arith.cmpi ne, %15, %c0_i32_6 : i32
    scf.if %16 {
      %c0 = arith.constant 0 : index
      %c0_7 = arith.constant 0 : index
      %17 = vector.load %arg5[%c0, %c0_7] : memref<8x128xf32, #tpu.memory_space<vmem>>, vector<8x128xf32>
      %18 = vector.shape_cast %17 : vector<8x128xf32> to vector<1x8x128xf32>
      %cst_8 = arith.constant dense<0.000000e+00> : vector<1xf32>
      %19 = vector.multi_reduction <add>, %18, %cst_8 [1, 2] : vector<1x8x128xf32> to vector<1xf32>
      %20 = vector.shape_cast %19 : vector<1xf32> to vector<1x1x1xf32>
      %21 = vector.extract %20[0, 0, 0] : f32 from vector<1x1x1xf32>
      %cst_9 = arith.constant 0.000000e+00 : f32
      %22 = arith.subf %cst_9, %21 : f32
      %c0_10 = arith.constant 0 : index
      %c0_11 = arith.constant 0 : index
      %23 = memref.load %arg4[%c0_10, %c0_11] : memref<1x1xf32, #tpu.memory_space<smem>>
      memref.store %22, %arg4[%c0_10, %c0_11] : memref<1x1xf32, #tpu.memory_space<smem>>
    } else {
    }
    return
  }
  func.func @transform_0(%arg0: i32, %arg1: i32) -> (i32, i32) {
    %c1_i32 = arith.constant 1 : i32
    %0 = arith.muli %arg0, %c1_i32 : i32
    %1 = arith.addi %0, %arg1 : i32
    %c0_i32 = arith.constant 0 : i32
    %2 = arith.minsi %1, %c0_i32 : i32
    %c0_i32_0 = arith.constant 0 : i32
    %c0_i32_1 = arith.constant 0 : i32
    return %2, %c0_i32_0 : i32, i32
  }
  func.func @transform_1(%arg0: i32, %arg1: i32) -> (i32, i32) {
    %c1_i32 = arith.constant 1 : i32
    %0 = arith.muli %arg0, %c1_i32 : i32
    %1 = arith.addi %0, %arg1 : i32
    %c0_i32 = arith.constant 0 : i32
    %2 = arith.minsi %1, %c0_i32 : i32
    %c0_i32_0 = arith.constant 0 : i32
    %c0_i32_1 = arith.constant 0 : i32
    return %2, %c0_i32_0 : i32, i32
  }
  func.func @transform_2(%arg0: i32, %arg1: i32) -> (i32, i32) {
    %c0_i32 = arith.constant 0 : i32
    %c0_i32_0 = arith.constant 0 : i32
    return %arg0, %c0_i32 : i32, i32
  }
}

</mosaic_0001>

<bundles_post_ra>
// kernel: quantum_cross_entropy_loss.1
= control target key start
LH: loop header
LB: loop body
LE: loop exit
PB: predicated region body
PF: predicated region fallthrough
CT: control target
= control target key end

     0   :  { %s234_s0 = inlined_call_operand.vmem [shape: f32[16,128], index: 0, kind: input, shape index: {}]   ;;  %s235_s1 = inlined_call_operand.vmem [shape: f32[16,128], index: 1, kind: input, shape index: {}]   ;;  %s236_s2 = inlined_call_operand.hbm [shape: f32[1,1], index: 2, kind: output, shape index: {}]  }
   0x1   :  { %v88_v0 = vld [vmem:[%s234_s0] sm:$0xff]  ;;  %v89_v1 = vld [vmem:[%s234_s0 + $0x8] sm:$0xff] }
   0x2   :  { %v92_v2 = vadd.f32 1e-09, %v88_v0  ;;  %v93_v3 = vadd.f32 1e-09, %v89_v1 }
   0x3   :  { %7 = vsyncpa [#allocation4], 0  ;;  %v90_v5 = vld [vmem:[%s235_s1] sm:$0xff]  ;;  %v91_v7 = vld [vmem:[%s235_s1 + $0x8] sm:$0xff]  ;;  %s160_s18 = sshll.u32 %s236_s2, 4  ;;  %s203_s20 = smov [#allocation3]   ;;  %s161_s18 = int_to_ptr.hbm [resolvable:$true] %s160_s18 }
   0x4   :  { %185 = vlog2.f32 %v92_v2 }
   0x5   :  { %187 = vlog2.f32 %v93_v3 }
   0xa   :  { %v186_v4 = vpop.eup %185 }
   0xb   :  { %v188_v6 = vpop.eup %187  ;;  %v95_v8 = vmul.f32 0.6931472, %v186_v4 }
   0xc   :  { %v97_v9 = vmul.f32 0.6931472, %v188_v6 }
   0xd   :  { %v98_v10 = vmul.f32 %v95_v8, %v90_v5 }
   0xe   :  { %v99_v11 = vmul.f32 %v97_v9, %v91_v7 }
  0x10   :  { %v103_v12 = vadd.f32 %v99_v11, %v98_v10 }
  0x12   :  { %143 = vadd.xlane.f32.xlu0 %v103_v12 }
  0x85   :  { %v144_v13 = vpop.xlane.xlu0 %143 }
  0x86   :  { %v145_v14 = vrot.slane %v144_v13, 4 }
  0x88   :  { %v146_v15 = vadd.f32 %v145_v14, %v144_v13 }
  0x8a   :  { %v147_v16 = vrot.slane %v146_v15, 2 }
  0x8c   :  { %v148_v17 = vadd.f32 %v147_v16, %v146_v15 }
  0x8e   :  { %v149_v18 = vrot.slane %v148_v17, 1 }
  0x90   :  { %v150_v19 = vadd.f32 %v149_v18, %v148_v17 }
  0x92   :  { %182 = vpush %v150_v19 }
  0xc3   :  { %s183_s19 = spop %182 }
  0xc4   :  { %s152_s1 = ssub.f32 0.0, %s183_s19 }
  0xc6   :  { %154 = sst [smem:[#allocation3]] %s152_s1 }
  0xc7   :  { %163 = dma.smem_to_hbm %s203_s20, 16, %s161_s18, [#allocation4]  }
  0xc8   :  { %201 = dma.done.wait [#allocation4], 16  }
  0xc9   :  { %202 = vsyncadd [#allocation4], 4294967280 }
  0xca   :  { %168 = sfence }
  0xcb   :  { %169 = vsyncpa [#allocation4], 1 }

</bundles_post_ra>
